<compile_context>
chip_gen: v6e
topology: v6e:2x2x1
jax: 0.10.0
libtpu: 0.0.40
codegen_flags: <defaults>
</compile_context>

<pallas_src>
import functools

import numpy as np

import jax
import jax.numpy as jnp
from jax.experimental import pallas as pl
from jax.experimental.pallas import tpu as pltpu


H_IN = W_IN = 8
D_IN = 1 * H_IN * W_IN      # 64   flattened input image
D_C1 = 8 * 4 * 4            # 128  conv1 output, NCHW-flattened
D_UP = 8 * 8 * 8            # 512  deconv output, NCHW-flattened
D_OUT = 1 * 8 * 8           # 64   final image, flattened


# ----------------------------------------------------------------------------
# Fused forward kernel: 5 chained matmuls + activations, one batch tile / step
# ----------------------------------------------------------------------------
def _fused_cae_kernel(x_ref, w1_ref, b1_ref, w2_ref, b2_ref, w3_ref, b3_ref,
                      w4_ref, b4_ref, w5_ref, b5_ref, o_ref, *, mxu_dtype):
    def mm(a, w_ref, b_ref):
        # bf16 (or f32) MXU inputs, f32 accumulation, f32 epilogue.
        return jnp.dot(a.astype(mxu_dtype), w_ref[...],
                       preferred_element_type=jnp.float32) + b_ref[...]

    x = x_ref[...]                                        # (Bt, 64)  f32
    h = jnp.maximum(mm(x, w1_ref, b1_ref), 0.0)           # conv1+ReLU -> (Bt,128)
    z = mm(h, w2_ref, b2_ref)                             # fc_enc     -> (Bt,latent)
    h = jnp.maximum(mm(z, w3_ref, b3_ref), 0.0)           # fc_dec+ReLU-> (Bt,128)
    h = jnp.maximum(mm(h, w4_ref, b4_ref), 0.0)           # deconv+ReLU-> (Bt,512)
    y = mm(h, w5_ref, b5_ref)                             # conv_out   -> (Bt,64)
    # sigmoid: exp on EUP + approximate reciprocal (EUP slot), all f32
    y = pl.reciprocal(1.0 + jnp.exp(-y), approx=True)
    o_ref[...] = y.astype(o_ref.dtype)


def _round_up(a, b):
    return (a + b - 1) // b * b


def cae_forward(fused, x_nchw, *, batch_tile=256):
    """Fused CAE forward.  x_nchw: (N,1,8,8) -> (N,1,8,8)."""
    n = x_nchw.shape[0]
    assert x_nchw.shape[1:] == (1, H_IN, W_IN), x_nchw.shape
    x = x_nchw.reshape(n, D_IN).astype(jnp.float32)       # lane-dense (N,64) slab

    bt = min(batch_tile, _round_up(n, 8))                 # rows per grid step (mult of 8)
    npad = _round_up(n, bt)
    if npad != n:
        x = jnp.pad(x, ((0, npad - n), (0, 0)))

    mxu_dtype = fused["w1"].dtype

    in_specs = [pl.BlockSpec((bt, D_IN), lambda i: (i, 0))]
    operands = [x]
    for name in ("w1", "b1", "w2", "b2", "w3", "b3", "w4", "b4", "w5", "b5"):
        arr = fused[name]
        # full-array blocks, constant index_map -> DMA'd once, VMEM resident
        in_specs.append(pl.BlockSpec(arr.shape, lambda i: (0, 0)))
        operands.append(arr)

    out = pl.pallas_call(
        functools.partial(_fused_cae_kernel, mxu_dtype=mxu_dtype),
        out_shape=jax.ShapeDtypeStruct((npad, D_OUT), jnp.float32),
        grid=(npad // bt,),
        in_specs=in_specs,
        out_specs=pl.BlockSpec((bt, D_OUT), lambda i: (i, 0)),
        compiler_params=pltpu.CompilerParams(
            dimension_semantics=("parallel",),          # v7x: shard batch over 2 TCs
            vmem_limit_bytes=32 * 1024 * 1024),
    )(*operands)

    return out[:n].reshape(n, 1, H_IN, W_IN)


# ----------------------------------------------------------------------------
# One-time weight preparation: lower each conv layer to a dense matmul matrix
# acting on NCHW-flattened per-sample vectors (PyTorch semantics by definition).
# ----------------------------------------------------------------------------
def _conv2d_as_matrix(w, stride, pad, h, w_in):
    """PyTorch Conv2d weight (Cout,Cin,kh,kw) -> (Cin*h*w, Cout*Ho*Wo)."""
    w = np.asarray(w, np.float32)
    cout, cin, kh, kw = w.shape
    ho = (h + 2 * pad - kh) // stride + 1
    wo = (w_in + 2 * pad - kw) // stride + 1
    m = np.zeros((cin * h * w_in, cout * ho * wo), np.float32)
    for co in range(cout):
        for oy in range(ho):
            for ox in range(wo):
                oi = co * ho * wo + oy * wo + ox
                for ci in range(cin):
                    for ky in range(kh):
                        iy = oy * stride - pad + ky
                        if iy < 0 or iy >= h:
                            continue
                        for kx in range(kw):
                            ix = ox * stride - pad + kx
                            if ix < 0 or ix >= w_in:
                                continue
                            m[ci * h * w_in + iy * w_in + ix, oi] += w[co, ci, ky, kx]
    return m


def _conv_transpose2d_as_matrix(w, stride, pad, out_pad, h, w_in):
    """PyTorch ConvTranspose2d weight (Cin,Cout,kh,kw) -> (Cin*h*w, Cout*Ho*Wo)."""
    w = np.asarray(w, np.float32)
    cin, cout, kh, kw = w.shape
    ho = (h - 1) * stride - 2 * pad + kh + out_pad
    wo = (w_in - 1) * stride - 2 * pad + kw + out_pad
    m = np.zeros((cin * h * w_in, cout * ho * wo), np.float32)
    for ci in range(cin):
        for iy in range(h):
            for ix in range(w_in):
                ii = ci * h * w_in + iy * w_in + ix
                for co in range(cout):
                    for ky in range(kh):
                        oy = iy * stride - pad + ky
                        if oy < 0 or oy >= ho:
                            continue
                        for kx in range(kw):
                            ox = ix * stride - pad + kx
                            if ox < 0 or ox >= wo:
                                continue
                            m[ii, co * ho * wo + oy * wo + ox] += w[ci, co, ky, kx]
    return m


def prepare_fused_params(params, use_bf16=True):
    """Build dense matmul weights (K,N layout) + flattened biases, once."""
    wdt = jnp.bfloat16 if use_bf16 else jnp.float32
    w1 = _conv2d_as_matrix(params["conv1_w"], 2, 1, 8, 8)                 # (64, 128)
    w4 = _conv_transpose2d_as_matrix(params["deconv_w"], 2, 1, 1, 4, 4)   # (128, 512)
    w5 = _conv2d_as_matrix(params["conv_out_w"], 1, 1, 8, 8)              # (512, 64)
    b1 = np.repeat(np.asarray(params["conv1_b"], np.float32), 16)         # (128,)
    b4 = np.repeat(np.asarray(params["deconv_b"], np.float32), 64)        # (512,)
    b5 = np.repeat(np.asarray(params["conv_out_b"], np.float32), 64)      # (64,)
    return {
        "w1": jnp.asarray(w1, wdt),
        "b1": jnp.asarray(b1, jnp.float32).reshape(1, -1),
        "w2": jnp.asarray(params["fc_enc_w"]).T.astype(wdt),              # (128, latent)
        "b2": jnp.asarray(params["fc_enc_b"], jnp.float32).reshape(1, -1),
        "w3": jnp.asarray(params["fc_dec_w"]).T.astype(wdt),              # (latent, 128)
        "b3": jnp.asarray(params["fc_dec_b"], jnp.float32).reshape(1, -1),
        "w4": jnp.asarray(w4, wdt),
        "b4": jnp.asarray(b4, jnp.float32).reshape(1, -1),
        "w5": jnp.asarray(w5, wdt),
        "b5": jnp.asarray(b5, jnp.float32).reshape(1, -1),
    }


# ----------------------------------------------------------------------------
# Deterministic parameter init (PyTorch layout) + pure-JAX reference forward
# ----------------------------------------------------------------------------
def init_params(latent_dims=16, seed=0):
    key = jax.random.PRNGKey(seed)
    ks = jax.random.split(key, 10)
    s = 0.1
    return {
        "conv1_w": s * jax.random.normal(ks[0], (8, 1, 3, 3), jnp.float32),
        "conv1_b": s * jax.random.normal(ks[1], (8,), jnp.float32),
        "fc_enc_w": s * jax.random.normal(ks[2], (latent_dims, 128), jnp.float32),
        "fc_enc_b": s * jax.random.normal(ks[3], (latent_dims,), jnp.float32),
        "fc_dec_w": s * jax.random.normal(ks[4], (128, latent_dims), jnp.float32),
        "fc_dec_b": s * jax.random.normal(ks[5], (128,), jnp.float32),
        "deconv_w": s * jax.random.normal(ks[6], (8, 8, 3, 3), jnp.float32),   # (Cin,Cout,kh,kw)
        "deconv_b": s * jax.random.normal(ks[7], (8,), jnp.float32),
        "conv_out_w": s * jax.random.normal(ks[8], (1, 8, 3, 3), jnp.float32),
        "conv_out_b": s * jax.random.normal(ks[9], (1,), jnp.float32),
    }


def ref_forward(params, x_nchw):
    """Pure-JAX layer-by-layer reference (PyTorch semantics) for validation."""
    dn = ("NCHW", "OIHW", "NCHW")
    h = jax.lax.conv_general_dilated(x_nchw, params["conv1_w"], (2, 2),
                                     ((1, 1), (1, 1)), dimension_numbers=dn)
    h = jax.nn.relu(h + params["conv1_b"][None, :, None, None])
    h = h.reshape(x_nchw.shape[0], -1)
    z = h @ params["fc_enc_w"].T + params["fc_enc_b"]
    h = jax.nn.relu(z @ params["fc_dec_w"].T + params["fc_dec_b"])
    h = h.reshape(-1, 8, 4, 4)
    # ConvTranspose2d(s=2,p=1,op=1) == conv of lhs-dilated input with flipped,
    # channel-swapped kernel and asymmetric padding (k-1-p, k-1-p+op).
    w_eq = jnp.transpose(params["deconv_w"], (1, 0, 2, 3))[:, :, ::-1, ::-1]
    h = jax.lax.conv_general_dilated(h, w_eq, (1, 1), ((1, 2), (1, 2)),
                                     lhs_dilation=(2, 2), dimension_numbers=dn)
    h = jax.nn.relu(h + params["deconv_b"][None, :, None, None])
    y = jax.lax.conv_general_dilated(h, params["conv_out_w"], (1, 1),
                                     ((1, 1), (1, 1)), dimension_numbers=dn)
    return jax.nn.sigmoid(y + params["conv_out_b"][None, :, None, None])


if __name__ == "__main__":
    params = init_params(latent_dims=16, seed=0)
    fused = prepare_fused_params(params, use_bf16=True)

    x = jax.random.normal(jax.random.PRNGKey(0), (2, 1, 8, 8), jnp.float32)

    fwd = jax.jit(cae_forward)
    out = fwd(fused, x)
    jax.block_until_ready(out)

    assert out.shape == (2, 1, 8, 8), out.shape
    assert bool(jnp.all(jnp.isfinite(out)))

    ref = ref_forward(params, x)
    err = float(jnp.max(jnp.abs(out - ref)))
    assert err < 2e-2, f"max abs error vs pure-JAX reference = {err}"

    print("KERNEL_OK")
</pallas_src>

<mosaic_0001>
module attributes {stable_mosaic.version = 11 : i64} {
  func.func @_fused_cae_kernel(%arg0: i32, %arg1: memref<8x64xf32, #tpu.memory_space<vmem>>, %arg2: memref<64x128xbf16, #tpu.memory_space<vmem>>, %arg3: memref<1x128xf32, #tpu.memory_space<vmem>>, %arg4: memref<128x16xbf16, #tpu.memory_space<vmem>>, %arg5: memref<1x16xf32, #tpu.memory_space<vmem>>, %arg6: memref<16x128xbf16, #tpu.memory_space<vmem>>, %arg7: memref<1x128xf32, #tpu.memory_space<vmem>>, %arg8: memref<128x512xbf16, #tpu.memory_space<vmem>>, %arg9: memref<1x512xf32, #tpu.memory_space<vmem>>, %arg10: memref<512x64xbf16, #tpu.memory_space<vmem>>, %arg11: memref<1x64xf32, #tpu.memory_space<vmem>>, %arg12: memref<8x64xf32, #tpu.memory_space<vmem>>) attributes {dimension_semantics = [#tpu.dimension_semantics<parallel>], iteration_bounds = array<i64: 1>, scalar_prefetch = 0 : i64, scratch_operands = 0 : i64, tpu.core_type = #tpu.core_type<tc>, window_params = [{transform_indices = @transform_0, window_bounds = array<i64: 8, 64>}, {pipeline_mode = #tpu.pipeline_mode<synchronous>, transform_indices = @transform_1, window_bounds = array<i64: 64, 128>}, {pipeline_mode = #tpu.pipeline_mode<synchronous>, transform_indices = @transform_2, window_bounds = array<i64: 1, 128>}, {pipeline_mode = #tpu.pipeline_mode<synchronous>, transform_indices = @transform_3, window_bounds = array<i64: 128, 16>}, {pipeline_mode = #tpu.pipeline_mode<synchronous>, transform_indices = @transform_4, window_bounds = array<i64: 1, 16>}, {pipeline_mode = #tpu.pipeline_mode<synchronous>, transform_indices = @transform_5, window_bounds = array<i64: 16, 128>}, {pipeline_mode = #tpu.pipeline_mode<synchronous>, transform_indices = @transform_6, window_bounds = array<i64: 1, 128>}, {pipeline_mode = #tpu.pipeline_mode<synchronous>, transform_indices = @transform_7, window_bounds = array<i64: 128, 512>}, {pipeline_mode = #tpu.pipeline_mode<synchronous>, transform_indices = @transform_8, window_bounds = array<i64: 1, 512>}, {pipeline_mode = #tpu.pipeline_mode<synchronous>, transform_indices = @transform_9, window_bounds = array<i64: 512, 64>}, {pipeline_mode = #tpu.pipeline_mode<synchronous>, transform_indices = @transform_10, window_bounds = array<i64: 1, 64>}, {transform_indices = @transform_11, window_bounds = array<i64: 8, 64>}]} {
    %c0 = arith.constant 0 : index
    %c0_0 = arith.constant 0 : index
    %0 = vector.load %arg1[%c0, %c0_0] : memref<8x64xf32, #tpu.memory_space<vmem>>, vector<8x64xf32>
    %1 = arith.truncf %0 : vector<8x64xf32> to vector<8x64xbf16>
    %c0_1 = arith.constant 0 : index
    %c0_2 = arith.constant 0 : index
    %2 = vector.load %arg2[%c0_1, %c0_2] : memref<64x128xbf16, #tpu.memory_space<vmem>>, vector<64x128xbf16>
    %cst = arith.constant dense<0.000000e+00> : vector<8x128xf32>
    %3 = tpu.matmul %1, %2, %cst {dimension_numbers = #tpu.dot_dimension_numbers<[1], [0], [0], [1], [0, 0, 1, 1], [], []>} : vector<8x64xbf16>, vector<64x128xbf16>, vector<8x128xf32> -> vector<8x128xf32>
    %c0_3 = arith.constant 0 : index
    %c0_4 = arith.constant 0 : index
    %4 = vector.load %arg3[%c0_3, %c0_4] : memref<1x128xf32, #tpu.memory_space<vmem>>, vector<1x128xf32>
    %5 = vector.broadcast %4 : vector<1x128xf32> to vector<8x128xf32>
    %6 = arith.addf %3, %5 : vector<8x128xf32>
    %cst_5 = arith.constant 0.000000e+00 : f32
    %7 = vector.broadcast %cst_5 : f32 to vector<8x128xf32>
    %8 = arith.maximumf %6, %7 : vector<8x128xf32>
    %9 = arith.truncf %8 : vector<8x128xf32> to vector<8x128xbf16>
    %c0_6 = arith.constant 0 : index
    %c0_7 = arith.constant 0 : index
    %10 = vector.load %arg4[%c0_6, %c0_7] : memref<128x16xbf16, #tpu.memory_space<vmem>>, vector<128x16xbf16>
    %cst_8 = arith.constant dense<0.000000e+00> : vector<8x16xf32>
    %11 = tpu.matmul %9, %10, %cst_8 {dimension_numbers = #tpu.dot_dimension_numbers<[1], [0], [0], [1], [0, 0, 1, 1], [], []>} : vector<8x128xbf16>, vector<128x16xbf16>, vector<8x16xf32> -> vector<8x16xf32>
    %c0_9 = arith.constant 0 : index
    %c0_10 = arith.constant 0 : index
    %12 = vector.load %arg5[%c0_9, %c0_10] : memref<1x16xf32, #tpu.memory_space<vmem>>, vector<1x16xf32>
    %13 = vector.broadcast %12 : vector<1x16xf32> to vector<8x16xf32>
    %14 = arith.addf %11, %13 : vector<8x16xf32>
    %15 = arith.truncf %14 : vector<8x16xf32> to vector<8x16xbf16>
    %c0_11 = arith.constant 0 : index
    %c0_12 = arith.constant 0 : index
    %16 = vector.load %arg6[%c0_11, %c0_12] : memref<16x128xbf16, #tpu.memory_space<vmem>>, vector<16x128xbf16>
    %cst_13 = arith.constant dense<0.000000e+00> : vector<8x128xf32>
    %17 = tpu.matmul %15, %16, %cst_13 {dimension_numbers = #tpu.dot_dimension_numbers<[1], [0], [0], [1], [0, 0, 1, 1], [], []>} : vector<8x16xbf16>, vector<16x128xbf16>, vector<8x128xf32> -> vector<8x128xf32>
    %c0_14 = arith.constant 0 : index
    %c0_15 = arith.constant 0 : index
    %18 = vector.load %arg7[%c0_14, %c0_15] : memref<1x128xf32, #tpu.memory_space<vmem>>, vector<1x128xf32>
    %19 = vector.broadcast %18 : vector<1x128xf32> to vector<8x128xf32>
    %20 = arith.addf %17, %19 : vector<8x128xf32>
    %cst_16 = arith.constant 0.000000e+00 : f32
    %21 = vector.broadcast %cst_16 : f32 to vector<8x128xf32>
    %22 = arith.maximumf %20, %21 : vector<8x128xf32>
    %23 = arith.truncf %22 : vector<8x128xf32> to vector<8x128xbf16>
    %c0_17 = arith.constant 0 : index
    %c0_18 = arith.constant 0 : index
    %24 = vector.load %arg8[%c0_17, %c0_18] : memref<128x512xbf16, #tpu.memory_space<vmem>>, vector<128x512xbf16>
    %cst_19 = arith.constant dense<0.000000e+00> : vector<8x512xf32>
    %25 = tpu.matmul %23, %24, %cst_19 {dimension_numbers = #tpu.dot_dimension_numbers<[1], [0], [0], [1], [0, 0, 1, 1], [], []>} : vector<8x128xbf16>, vector<128x512xbf16>, vector<8x512xf32> -> vector<8x512xf32>
    %c0_20 = arith.constant 0 : index
    %c0_21 = arith.constant 0 : index
    %26 = vector.load %arg9[%c0_20, %c0_21] : memref<1x512xf32, #tpu.memory_space<vmem>>, vector<1x512xf32>
    %27 = vector.broadcast %26 : vector<1x512xf32> to vector<8x512xf32>
    %28 = arith.addf %25, %27 : vector<8x512xf32>
    %cst_22 = arith.constant 0.000000e+00 : f32
    %29 = vector.broadcast %cst_22 : f32 to vector<8x512xf32>
    %30 = arith.maximumf %28, %29 : vector<8x512xf32>
    %31 = arith.truncf %30 : vector<8x512xf32> to vector<8x512xbf16>
    %c0_23 = arith.constant 0 : index
    %c0_24 = arith.constant 0 : index
    %32 = vector.load %arg10[%c0_23, %c0_24] : memref<512x64xbf16, #tpu.memory_space<vmem>>, vector<512x64xbf16>
    %cst_25 = arith.constant dense<0.000000e+00> : vector<8x64xf32>
    %33 = tpu.matmul %31, %32, %cst_25 {dimension_numbers = #tpu.dot_dimension_numbers<[1], [0], [0], [1], [0, 0, 1, 1], [], []>} : vector<8x512xbf16>, vector<512x64xbf16>, vector<8x64xf32> -> vector<8x64xf32>
    %c0_26 = arith.constant 0 : index
    %c0_27 = arith.constant 0 : index
    %34 = vector.load %arg11[%c0_26, %c0_27] : memref<1x64xf32, #tpu.memory_space<vmem>>, vector<1x64xf32>
    %35 = vector.broadcast %34 : vector<1x64xf32> to vector<8x64xf32>
    %36 = arith.addf %33, %35 : vector<8x64xf32>
    %cst_28 = arith.constant 0.000000e+00 : f32
    %37 = vector.broadcast %cst_28 : f32 to vector<8x64xf32>
    %38 = arith.subf %37, %36 : vector<8x64xf32>
    %39 = math.exp %38 : vector<8x64xf32>
    %cst_29 = arith.constant 1.000000e+00 : f32
    %40 = vector.broadcast %cst_29 : f32 to vector<8x64xf32>
    %41 = arith.addf %40, %39 : vector<8x64xf32>
    %42 = tpu.reciprocal %41 {approx = true} : vector<8x64xf32> -> vector<8x64xf32>
    %c0_30 = arith.constant 0 : index
    %c0_31 = arith.constant 0 : index
    %43 = vector.load %arg12[%c0_30, %c0_31] : memref<8x64xf32, #tpu.memory_space<vmem>>, vector<8x64xf32>
    tpu.vector_store %arg12[%c0_30, %c0_31], %42 {strides = array<i32>} : memref<8x64xf32, #tpu.memory_space<vmem>>, vector<8x64xf32>,
    return
  }
  func.func @transform_0(%arg0: i32) -> (i32, i32) {
    %c0_i32 = arith.constant 0 : i32
    %c0_i32_0 = arith.constant 0 : i32
    return %arg0, %c0_i32 : i32, i32
  }
  func.func @transform_1(%arg0: i32) -> (i32, i32) {
    %c0_i32 = arith.constant 0 : i32
    %c0_i32_0 = arith.constant 0 : i32
    %c0_i32_1 = arith.constant 0 : i32
    return %c0_i32, %c0_i32_0 : i32, i32
  }
  func.func @transform_2(%arg0: i32) -> (i32, i32) {
    %c0_i32 = arith.constant 0 : i32
    %c0_i32_0 = arith.constant 0 : i32
    %c0_i32_1 = arith.constant 0 : i32
    return %c0_i32, %c0_i32_0 : i32, i32
  }
  func.func @transform_3(%arg0: i32) -> (i32, i32) {
    %c0_i32 = arith.constant 0 : i32
    %c0_i32_0 = arith.constant 0 : i32
    %c0_i32_1 = arith.constant 0 : i32
    return %c0_i32, %c0_i32_0 : i32, i32
  }
  func.func @transform_4(%arg0: i32) -> (i32, i32) {
    %c0_i32 = arith.constant 0 : i32
    %c0_i32_0 = arith.constant 0 : i32
    %c0_i32_1 = arith.constant 0 : i32
    return %c0_i32, %c0_i32_0 : i32, i32
  }
  func.func @transform_5(%arg0: i32) -> (i32, i32) {
    %c0_i32 = arith.constant 0 : i32
    %c0_i32_0 = arith.constant 0 : i32
    %c0_i32_1 = arith.constant 0 : i32
    return %c0_i32, %c0_i32_0 : i32, i32
  }
  func.func @transform_6(%arg0: i32) -> (i32, i32) {
    %c0_i32 = arith.constant 0 : i32
    %c0_i32_0 = arith.constant 0 : i32
    %c0_i32_1 = arith.constant 0 : i32
    return %c0_i32, %c0_i32_0 : i32, i32
  }
  func.func @transform_7(%arg0: i32) -> (i32, i32) {
    %c0_i32 = arith.constant 0 : i32
    %c0_i32_0 = arith.constant 0 : i32
    %c0_i32_1 = arith.constant 0 : i32
    return %c0_i32, %c0_i32_0 : i32, i32
  }
  func.func @transform_8(%arg0: i32) -> (i32, i32) {
    %c0_i32 = arith.constant 0 : i32
    %c0_i32_0 = arith.constant 0 : i32
    %c0_i32_1 = arith.constant 0 : i32
    return %c0_i32, %c0_i32_0 : i32, i32
  }
  func.func @transform_9(%arg0: i32) -> (i32, i32) {
    %c0_i32 = arith.constant 0 : i32
    %c0_i32_0 = arith.constant 0 : i32
    %c0_i32_1 = arith.constant 0 : i32
    return %c0_i32, %c0_i32_0 : i32, i32
  }
  func.func @transform_10(%arg0: i32) -> (i32, i32) {
    %c0_i32 = arith.constant 0 : i32
    %c0_i32_0 = arith.constant 0 : i32
    %c0_i32_1 = arith.constant 0 : i32
    return %c0_i32, %c0_i32_0 : i32, i32
  }
  func.func @transform_11(%arg0: i32) -> (i32, i32) {
    %c0_i32 = arith.constant 0 : i32
    %c0_i32_0 = arith.constant 0 : i32
    return %arg0, %c0_i32 : i32, i32
  }
}

</mosaic_0001>

<bundles_post_ra>
// kernel: cae_forward.1
= control target key start
LH: loop header
LB: loop body
LE: loop exit
PB: predicated region body
PF: predicated region fallthrough
CT: control target
= control target key end

     0   :  { %v1237_v0 = vmov 0.0   ;;  %vm1238_vm0 = vmmov 0   ;;  %vm80_vm1 = vcmask 523264   ;;  %vm253_vm2 = vcmask 130048   ;;  %s1557_s1 = inlined_call_operand.vmem [shape: bf16[64,128], index: 1, kind: input, shape index: {}]   ;;  %s1558_s3 = inlined_call_operand.vmem [shape: bf16[128,16], index: 3, kind: input, shape index: {}]   ;;  %s1559_s0 = inlined_call_operand.vmem [shape: f32[8,64], index: 0, kind: input, shape index: {}]   ;;  %s1560_s5 = inlined_call_operand.vmem [shape: bf16[16,128], index: 5, kind: input, shape index: {}]   ;;  %s1561_s2 = inlined_call_operand.vmem [shape: f32[1,128], index: 2, kind: input, shape index: {}]   ;;  %s1562_s7 = inlined_call_operand.vmem [shape: bf16[128,512], index: 7, kind: input, shape index: {}]   ;;  %s1563_s4 = inlined_call_operand.vmem [shape: f32[1,16], index: 4, kind: input, shape index: {}]   ;;  %s1564_s9 = inlined_call_operand.vmem [shape: bf16[512,64], index: 9, kind: input, shape index: {}]   ;;  %s1565_s6 = inlined_call_operand.vmem [shape: f32[1,128], index: 6, kind: input, shape index: {}]   ;;  %s1566_s8 = inlined_call_operand.vmem [shape: f32[1,512], index: 8, kind: input, shape index: {}]   ;;  %s1567_s10 = inlined_call_operand.vmem [shape: f32[1,64], index: 10, kind: input, shape index: {}]   ;;  %s1568_s11 = inlined_call_operand.vmem [shape: f32[8,64], index: 11, kind: output, shape index: {}]  }
   0x1   :  { %1099 = vmatprep.subr.bf16.mxu0 %v1237_v0  ;;  %v1140_v1 = vld [vmem:[%s1557_s1 + $0x18] sm:$0xff]   ;;  %1107 = vmatprep.mubr.msk.bf16.mxu0 %vm1238_vm0, %v1237_v0  ;;  %v1141_v2 = vld [vmem:[%s1557_s1 + $0x10] sm:$0xff]   ;;  %v1142_v4 = vld [vmem:[%s1557_s1 + $0x8] sm:$0xff]   ;;  %v1239_v63 = vmov 0  }
   0x2   :  { %1111 = vmatprep.subr.bf16.mxu1 %v1237_v0  ;;  %1127 = vmatprep.mubr.msk.bf16.mxu1 %vm1238_vm0, %v1237_v0  ;;  %v1144_v3 = vld [vmem:[%s1558_s3 + $0x38] sm:$0xff]   ;;  %v1145_v5 = vld [vmem:[%s1558_s3 + $0x30] sm:$0xff]   ;;  %v1143_v6 = vld [vmem:[%s1557_s1] sm:$0xff]  }
   0x3   :  { %1100 = vmatpush3.bf16.msra.mxu0 %v1140_v1  ;;  %1112 = vmatpush3.bf16.msra.mxu1 %v1144_v3  ;;  %v39_v7 = vld [vmem:[%s1559_s0] sm:$0xff]  ;;  %v1146_v8 = vld [vmem:[%s1558_s3 + $0x28] sm:$0xff]   ;;  %v1148_v11 = vld [vmem:[%s1558_s3 + $0x18] sm:$0xff]  }
   0x4   :  { %1101 = vmatprep.subr.bf16.mxu0 %v1237_v0  ;;  %1113 = vmatprep.subr.bf16.mxu1 %v1237_v0  ;;  %v40_v9 = vpack.c.bf16 %v39_v7, %v39_v7  ;;  %v1147_v10 = vld [vmem:[%s1558_s3 + $0x20] sm:$0xff]   ;;  %v1149_v12 = vld [vmem:[%s1558_s3 + $0x10] sm:$0xff]   ;;  %v1150_v13 = vld [vmem:[%s1558_s3 + $0x8] sm:$0xff]  }
   0x5   :  { %v1151_v14 = vld [vmem:[%s1558_s3] sm:$0xff]   ;;  %v1156_v25 = vld [vmem:[%s1562_s7 + $0xe8] ss:$16 sps:$4 sm:$0xff]   ;;  %v1158_v26 = vld [vmem:[%s1562_s7 + $0xec] ss:$16 sps:$4 sm:$0xff]  }
   0x6   :  { %v1152_v15 = vld [vmem:[%s1560_s5] sm:$0xff]   ;;  %v1162_v27 = vld [vmem:[%s1562_s7 + $0xc8] ss:$16 sps:$4 sm:$0xff]   ;;  %v1164_v28 = vld [vmem:[%s1562_s7 + $0xcc] ss:$16 sps:$4 sm:$0xff]  }
   0x7   :  { %1102 = vmatpush3.bf16.msra.mxu0 %v1141_v2  ;;  %1114 = vmatpush3.bf16.msra.mxu1 %v1145_v5  ;;  %v956_v16 = vld [vmem:[%s1561_s2] ss:$0 sm:$0xff]  ;;  %v1155_v24 = vld [vmem:[%s1562_s7 + $0xe4] ss:$16 sps:$4 sm:$0xff]   ;;  %v1170_v29 = vld [vmem:[%s1562_s7 + $0xac] ss:$16 sps:$4 sm:$0xff]  }
   0x8   :  { %1103 = vmatprep.subr.bf16.mxu0 %v1237_v0  ;;  %1115 = vmatprep.subr.bf16.mxu1 %v1237_v0  ;;  %v1168_v30 = vld [vmem:[%s1562_s7 + $0xa8] ss:$16 sps:$4 sm:$0xff]   ;;  %v1176_v31 = vld [vmem:[%s1562_s7 + $0x8c] ss:$16 sps:$4 sm:$0xff]   ;;  %v962_v39 = vld [vmem:[%s1563_s4] ss:$0 sm:$0xff] }
   0x9   :  { %v1174_v32 = vld [vmem:[%s1562_s7 + $0x88] ss:$16 sps:$4 sm:$0xff]   ;;  %v1182_v33 = vld [vmem:[%s1562_s7 + $0x6c] ss:$16 sps:$4 sm:$0xff]   ;;  %v1153_v43 = vld [vmem:[%s1562_s7 + $0xe0] ss:$16 sps:$4 sm:$0xff]  }
   0xa   :  { %v1180_v34 = vld [vmem:[%s1562_s7 + $0x68] ss:$16 sps:$4 sm:$0xff]   ;;  %v1188_v35 = vld [vmem:[%s1562_s7 + $0x4c] ss:$16 sps:$4 sm:$0xff]   ;;  %v1161_v45 = vld [vmem:[%s1562_s7 + $0xc4] ss:$16 sps:$4 sm:$0xff]  }
   0xb   :  { %1104 = vmatpush3.bf16.msra.mxu0 %v1142_v4  ;;  %1116 = vmatpush3.bf16.msra.mxu1 %v1146_v8  ;;  %v1186_v36 = vld [vmem:[%s1562_s7 + $0x48] ss:$16 sps:$4 sm:$0xff]   ;;  %v1194_v37 = vld [vmem:[%s1562_s7 + $0x2c] ss:$16 sps:$4 sm:$0xff]   ;;  %v1159_v48 = vld [vmem:[%s1562_s7 + $0xc0] ss:$16 sps:$4 sm:$0xff]  }
   0xc   :  { %1105 = vmatprep.subr.bf16.mxu0 %v1237_v0  ;;  %1117 = vmatprep.subr.bf16.mxu1 %v1237_v0  ;;  %v1192_v38 = vld [vmem:[%s1562_s7 + $0x28] ss:$16 sps:$4 sm:$0xff]   ;;  %v1167_v49 = vld [vmem:[%s1562_s7 + $0xa4] ss:$16 sps:$4 sm:$0xff]   ;;  %v1165_v50 = vld [vmem:[%s1562_s7 + $0xa0] ss:$16 sps:$4 sm:$0xff]  }
   0xd   :  { %v1173_v51 = vld [vmem:[%s1562_s7 + $0x84] ss:$16 sps:$4 sm:$0xff]   ;;  %v1171_v52 = vld [vmem:[%s1562_s7 + $0x80] ss:$16 sps:$4 sm:$0xff]   ;;  %v1200_v60 = vld [vmem:[%s1562_s7 + $0xc] ss:$16 sps:$4 sm:$0xff]  }
   0xe   :  { %v1179_v53 = vld [vmem:[%s1562_s7 + $0x64] ss:$16 sps:$4 sm:$0xff]   ;;  %v1177_v54 = vld [vmem:[%s1562_s7 + $0x60] ss:$16 sps:$4 sm:$0xff]   ;;  %v1198_v62 = vld [vmem:[%s1562_s7 + $0x8] ss:$16 sps:$4 sm:$0xff]  }
   0xf   :  { %1106 = vmatpush3.bf16.msra.mxu0 %v1143_v6  ;;  %1118 = vmatpush3.bf16.msra.mxu1 %v1147_v10  ;;  %v1185_v55 = vld [vmem:[%s1562_s7 + $0x44] ss:$16 sps:$4 sm:$0xff]   ;;  %v1183_v56 = vld [vmem:[%s1562_s7 + $0x40] ss:$16 sps:$4 sm:$0xff]   ;;  %v1202_v1 = vld [vmem:[%s1564_s9 + $0xf8] sm:$0xff]  }
  0x10   :  { %1131 = vmatprep.subr.bf16.mxu0 %v1237_v0  ;;  %1119 = vmatprep.subr.bf16.mxu1 %v1237_v0  ;;  %v1191_v57 = vld [vmem:[%s1562_s7 + $0x24] ss:$16 sps:$4 sm:$0xff]   ;;  %v1189_v58 = vld [vmem:[%s1562_s7 + $0x20] ss:$16 sps:$4 sm:$0xff]   ;;  %v1203_v8 = vld [vmem:[%s1564_s9 + $0x38] sm:$0xff]  }
  0x11   :  { %v1197_v59 = vld [vmem:[%s1562_s7 + $0x4] ss:$16 sps:$4 sm:$0xff]   ;;  %v1195_v61 = vld [vmem:[%s1562_s7] ss:$16 sps:$4 sm:$0xff]  }
  0x12   :  { %1108 = vmatmul.mubr.msk.bf16.vlgmr.msra.gmra.mxu0 %vm80_vm1, %v40_v9  ;;  %v971_v2 = vld [vmem:[%s1565_s6] ss:$0 sm:$0xff]  ;;  %v1204_v9 = vld [vmem:[%s1564_s9 + $0xb8] sm:$0xff]  }
  0x13   :  { %1133 = vmatprep.mubr.msk.bf16.mxu0 %vm1238_vm0, %v1237_v0  ;;  %1120 = vmatpush3.bf16.msra.mxu1 %v1148_v11  ;;  %v1205_v11 = vld [vmem:[%s1564_s9 + $0x70] sm:$0xff]  }
  0x14   :  { %1121 = vmatprep.subr.bf16.mxu1 %v1237_v0  ;;  %1132 = vmatpush3.bf16.msra.mxu0 %v1152_v15  ;;  %v1208_v15 = vld [vmem:[%s1564_s9 + $0xb0] sm:$0xff]  }
  0x15   :  { %513 = vmatprep.subr.bf16.mxu0 %v1155_v24  ;;  %v1217_v24 = vld [vmem:[%s1564_s9 + $0x58] sm:$0xff]  }
  0x17   :  { %1122 = vmatpush3.bf16.msra.mxu1 %v1149_v12  ;;  %v1206_v12 = vld [vmem:[%s1564_s9 + $0xf0] sm:$0xff]  }
  0x18   :  { %1123 = vmatprep.subr.bf16.mxu1 %v1237_v0 }
  0x1b   :  { %1124 = vmatpush3.bf16.msra.mxu1 %v1150_v13 }
  0x1c   :  { %1125 = vmatprep.subr.bf16.mxu1 %v1237_v0  ;;  %v1201_v0 = vld [vmem:[%s1564_s9 + $0x78] sm:$0xff]  }
  0x1f   :  { %1126 = vmatpush3.bf16.msra.mxu1 %v1151_v14  ;;  %v1207_v14 = vld [vmem:[%s1564_s9 + $0x30] sm:$0xff]  }
  0x20   :  { %554 = vmatprep.subr.bf16.mxu1 %v1158_v26  ;;  %v1219_v26 = vld [vmem:[%s1564_s9 + $0x18] sm:$0xff]  }
  0xd2   :  { %v118_v17 = vpop.f32.mrf.mxu0 }
  0xd3   :  { %v119_v18 = vadd.f32 %v956_v16, %v118_v17  ;;  %v1209_v16 = vld [vmem:[%s1564_s9 + $0x68] sm:$0xff]  }
  0xd4   :  { %v1109_v19 = vpop.f32.mrf.mxu0  ;;  %v1210_v17 = vld [vmem:[%s1564_s9 + $0xe8] sm:$0xff]  }
  0xd5   :  { %v124_v20 = vmax.f32 %v119_v18, 0.0  ;;  %v1211_v18 = vld [vmem:[%s1564_s9 + $0x28] sm:$0xff]  }
  0xd6   :  { %v121_v21 = vpop.f32.mrf.mxu0  ;;  %v1212_v19 = vld [vmem:[%s1564_s9 + $0xa8] sm:$0xff]  }
  0xd7   :  { %v125_v22 = vpack.c.bf16 %v124_v20, %v124_v20  ;;  %v1213_v20 = vld [vmem:[%s1564_s9 + $0x60] sm:$0xff]  }
  0xd8   :  { %v1110_v23 = vpop.f32.mrf.mxu0  ;;  %v1214_v21 = vld [vmem:[%s1564_s9 + $0xe0] sm:$0xff]  }
  0xd9   :  { %1128 = vmatmul.mubr.bf16.vlgmr.msra.gmra.mxu1 %v125_v22  ;;  %v1215_v22 = vld [vmem:[%s1564_s9 + $0x20] sm:$0xff]  }
  0xda   :  { %555 = vmatpush1.bf16.msra.mxu1 %v1156_v25  ;;  %586 = vmatprep.mubr.bf16.mxu1 %v1239_v63  ;;  %v1216_v23 = vld [vmem:[%s1564_s9 + $0xa0] sm:$0xff]   ;;  %v1218_v25 = vld [vmem:[%s1564_s9 + $0xd8] sm:$0xff]  }
  0xdb   :  { %556 = vmatprep.subr.bf16.mxu1 %v1164_v28  ;;  %v1221_v28 = vld [vmem:[%s1564_s9 + $0x50] sm:$0xff]  }
  0xde   :  { %557 = vmatpush1.bf16.msra.mxu1 %v1162_v27  ;;  %v1220_v27 = vld [vmem:[%s1564_s9 + $0x98] sm:$0xff]  }
  0xdf   :  { %558 = vmatprep.subr.bf16.mxu1 %v1170_v29  ;;  %v1222_v29 = vld [vmem:[%s1564_s9 + $0xd0] sm:$0xff]  }
  0xe2   :  { %559 = vmatpush1.bf16.msra.mxu1 %v1168_v30  ;;  %v1223_v30 = vld [vmem:[%s1564_s9 + $0x10] sm:$0xff]  }
  0xe3   :  { %560 = vmatprep.subr.bf16.mxu1 %v1176_v31  ;;  %v1224_v31 = vld [vmem:[%s1564_s9 + $0x90] sm:$0xff]  }
  0xe6   :  { %561 = vmatpush1.bf16.msra.mxu1 %v1174_v32  ;;  %v1225_v32 = vld [vmem:[%s1564_s9 + $0x48] sm:$0xff]  }
  0xe7   :  { %562 = vmatprep.subr.bf16.mxu1 %v1182_v33  ;;  %v1226_v33 = vld [vmem:[%s1564_s9 + $0xc8] sm:$0xff]  }
  0xea   :  { %563 = vmatpush1.bf16.msra.mxu1 %v1180_v34  ;;  %v1227_v34 = vld [vmem:[%s1564_s9 + $0x8] sm:$0xff]  }
  0xeb   :  { %564 = vmatprep.subr.bf16.mxu1 %v1188_v35  ;;  %v1228_v35 = vld [vmem:[%s1564_s9 + $0x88] sm:$0xff]  }
  0xee   :  { %565 = vmatpush1.bf16.msra.mxu1 %v1186_v36  ;;  %v1229_v36 = vld [vmem:[%s1564_s9 + $0x40] sm:$0xff]  }
  0xef   :  { %566 = vmatprep.subr.bf16.mxu1 %v1194_v37  ;;  %v1230_v37 = vld [vmem:[%s1564_s9 + $0xc0] sm:$0xff]  }
  0xf2   :  { %567 = vmatpush1.bf16.msra.mxu1 %v1192_v38  ;;  %v1231_v38 = vld [vmem:[%s1564_s9] sm:$0xff]  }
  0xf3   :  { %568 = vmatprep.subr.bf16.mxu1 %v1200_v60 }
  0xf6   :  { %569 = vmatpush1.bf16.msra.mxu1 %v1198_v62 }
  0xf7   :  { %1077 = vmatprep.subr.bf16.mxu1 %v1202_v1 }
 0x199   :  { %v231_v40 = vpop.f32.mrf.mxu1 }
 0x19a   :  { %v232_v41 = vadd.f32 %v962_v39, %v231_v40  ;;  %v1232_v39 = vld [vmem:[%s1564_s9 + $0x80] sm:$0xff]   ;;  %v333_v40 = vlaneseq }
 0x19b   :  { %v1129_v42 = vpop.f32.mrf.mxu1 }
 0x19c   :  { %v237_v44 = vpack.c.bf16 %v232_v41, %v232_v41  ;;  %v334_v41 = vshrl.u32 %v333_v40, 7 }
 0x19d   :  { %v234_v46 = vpop.f32.mrf.mxu1 }
 0x19e   :  { %1134 = vmatmul.mubr.msk.bf16.vlgmr.msra.gmra.mxu0 %vm253_vm2, %v237_v44  ;;  %v335_v42 = vsub.s32 0, %v334_v41  ;;  %v331_v44 = vld [vmem:[%s1566_s8] sm:$0xf]  ;;  %v347_v46 = vsub.s32 3, %v334_v41 }
 0x19f   :  { %v1130_v47 = vpop.f32.mrf.mxu1  ;;  %514 = vmatpush1.bf16.msra.mxu0 %v1153_v43  ;;  %545 = vmatprep.mubr.bf16.mxu0 %v1239_v63  ;;  %v343_v43 = vsub.s32 2, %v334_v41 }
 0x1a0   :  { %515 = vmatprep.subr.bf16.mxu0 %v1161_v45  ;;  %v339_v45 = vsub.s32 1, %v334_v41  ;;  %v336_v47 = vrot.slane %v331_v44, %v335_v42 }
 0x1a3   :  { %516 = vmatpush1.bf16.msra.mxu0 %v1159_v48  ;;  %v344_v48 = vrot.slane %v331_v44, %v343_v43 }
 0x1a4   :  { %517 = vmatprep.subr.bf16.mxu0 %v1167_v49  ;;  %v340_v49 = vrot.slane %v331_v44, %v339_v45 }
 0x1a7   :  { %518 = vmatpush1.bf16.msra.mxu0 %v1165_v50  ;;  %v348_v50 = vrot.slane %v331_v44, %v347_v46 }
 0x1a8   :  { %519 = vmatprep.subr.bf16.mxu0 %v1173_v51 }
 0x1ab   :  { %520 = vmatpush1.bf16.msra.mxu0 %v1171_v52 }
 0x1ac   :  { %521 = vmatprep.subr.bf16.mxu0 %v1179_v53 }
 0x1af   :  { %522 = vmatpush1.bf16.msra.mxu0 %v1177_v54 }
 0x1b0   :  { %523 = vmatprep.subr.bf16.mxu0 %v1185_v55 }
 0x1b3   :  { %524 = vmatpush1.bf16.msra.mxu0 %v1183_v56 }
 0x1b4   :  { %525 = vmatprep.subr.bf16.mxu0 %v1191_v57 }
 0x1b7   :  { %526 = vmatpush1.bf16.msra.mxu0 %v1189_v58 }
 0x1b8   :  { %527 = vmatprep.subr.bf16.mxu0 %v1197_v59 }
 0x1bb   :  { %528 = vmatpush1.bf16.msra.mxu0 %v1195_v61 }
 0x1bc   :  { %1055 = vmatprep.subr.bf16.mxu0 %v1201_v0 }
 0x25e   :  { %v291_v3 = vpop.f32.mrf.mxu0 }
 0x25f   :  { %v292_v4 = vadd.f32 %v971_v2, %v291_v3 }
 0x260   :  { %v1135_v5 = vpop.f32.mrf.mxu0 }
 0x261   :  { %v297_v6 = vmax.f32 %v292_v4, 0.0 }
 0x262   :  { %v294_v7 = vpop.f32.mrf.mxu0 }
 0x263   :  { %v298_v10 = vpack.c.bf16 %v297_v6, %v297_v6 }
 0x264   :  { %v1136_v13 = vpop.f32.mrf.mxu0 }
 0x265   :  { %546 = vmatmul.mubr.bf16.vlgmr.msra.gmra.mxu0 %v298_v10  ;;  %587 = vmatmul.mubr.bf16.vlgmr.msra.gmra.mxu1 %v298_v10 }
 0x266   :  { %1056 = vmatpush3.bf16.msra.mxu0 %v1203_v8  ;;  %1078 = vmatpush3.bf16.msra.mxu1 %v1204_v9  ;;  %v1006_v9 = vld [vmem:[%s1567_s10] ss:$0 sm:$0xff] }
 0x267   :  { %1057 = vmatprep.subr.bf16.mxu0 %v1205_v11  ;;  %1079 = vmatprep.subr.bf16.mxu1 %v1206_v12 }
 0x26a   :  { %1058 = vmatpush3.bf16.msra.mxu0 %v1207_v14  ;;  %1080 = vmatpush3.bf16.msra.mxu1 %v1208_v15 }
 0x26b   :  { %1059 = vmatprep.subr.bf16.mxu0 %v1209_v16  ;;  %1081 = vmatprep.subr.bf16.mxu1 %v1210_v17 }
 0x26e   :  { %1060 = vmatpush3.bf16.msra.mxu0 %v1211_v18  ;;  %1082 = vmatpush3.bf16.msra.mxu1 %v1212_v19 }
 0x26f   :  { %1061 = vmatprep.subr.bf16.mxu0 %v1213_v20  ;;  %1083 = vmatprep.subr.bf16.mxu1 %v1214_v21 }
 0x272   :  { %1062 = vmatpush3.bf16.msra.mxu0 %v1215_v22  ;;  %1084 = vmatpush3.bf16.msra.mxu1 %v1216_v23 }
 0x273   :  { %1063 = vmatprep.subr.bf16.mxu0 %v1217_v24  ;;  %1085 = vmatprep.subr.bf16.mxu1 %v1218_v25 }
 0x276   :  { %1064 = vmatpush3.bf16.msra.mxu0 %v1219_v26  ;;  %1086 = vmatpush3.bf16.msra.mxu1 %v1220_v27 }
 0x277   :  { %1065 = vmatprep.subr.bf16.mxu0 %v1221_v28  ;;  %1087 = vmatprep.subr.bf16.mxu1 %v1222_v29 }
 0x27a   :  { %1066 = vmatpush3.bf16.msra.mxu0 %v1223_v30  ;;  %1088 = vmatpush3.bf16.msra.mxu1 %v1224_v31 }
 0x27b   :  { %1067 = vmatprep.subr.bf16.mxu0 %v1225_v32  ;;  %1089 = vmatprep.subr.bf16.mxu1 %v1226_v33 }
 0x27e   :  { %1068 = vmatpush3.bf16.msra.mxu0 %v1227_v34  ;;  %1090 = vmatpush3.bf16.msra.mxu1 %v1228_v35 }
 0x27f   :  { %1069 = vmatprep.subr.bf16.mxu0 %v1229_v36  ;;  %1091 = vmatprep.subr.bf16.mxu1 %v1230_v37 }
 0x282   :  { %1070 = vmatpush3.bf16.msra.mxu0 %v1231_v38  ;;  %1092 = vmatpush3.bf16.msra.mxu1 %v1232_v39 }
 0x325   :  { %v547_v51 = vpop.f32.mrf.mxu0  ;;  %v588_v52 = vpop.f32.mrf.mxu1 }
 0x326   :  { %v548_v53 = vadd.f32 %v547_v51, %v336_v47  ;;  %v589_v54 = vadd.f32 %v588_v52, %v344_v48 }
 0x327   :  { %v549_v55 = vpop.f32.mrf.mxu0  ;;  %v590_v56 = vpop.f32.mrf.mxu1 }
 0x328   :  { %v550_v57 = vadd.f32 %v549_v55, %v340_v49  ;;  %v591_v58 = vadd.f32 %v590_v56, %v348_v50  ;;  %v595_v59 = vmax.f32 %v548_v53, 0.0  ;;  %v597_v60 = vmax.f32 %v589_v54, 0.0 }
 0x329   :  { %v551_v61 = vpop.f32.mrf.mxu0  ;;  %v592_v62 = vpop.f32.mrf.mxu1 }
 0x32a   :  { %v596_v63 = vmax.f32 %v550_v57, 0.0  ;;  %v598_v0 = vmax.f32 %v591_v58, 0.0  ;;  %v599_v5 = vpack.c.bf16 %v595_v59, %v595_v59  ;;  %v601_v6 = vpack.c.bf16 %v597_v60, %v597_v60 }
 0x32b   :  { %v552_v1 = vpop.f32.mrf.mxu0  ;;  %v593_v2 = vpop.f32.mrf.mxu1 }
 0x32c   :  { %v600_v3 = vpack.c.bf16 %v596_v63, %v596_v63  ;;  %v602_v4 = vpack.c.bf16 %v598_v0, %v598_v0 }
 0x32e   :  { %898 = vmatprep.mubr.bf16.mxu0 %v600_v3  ;;  %938 = vmatprep.mubr.bf16.mxu1 %v602_v4 }
 0x32f   :  { %899 = vmatmul.mubr.bf16.vlgmr.msra.gmra.mxu0 %v599_v5  ;;  %939 = vmatmul.mubr.bf16.vlgmr.msra.gmra.mxu1 %v601_v6 }
 0x3ef   :  { %v1071_v7 = vpop.f32.mrf.mxu0  ;;  %v1093_v8 = vpop.f32.mrf.mxu1 }
 0x3f1   :  { %v1072_v10 = vpop.f32.mrf.mxu0  ;;  %v1094_v11 = vpop.f32.mrf.mxu1 }
 0x3f2   :  { %v1073_v12 = vadd.f32 %v1072_v10, %v1071_v7  ;;  %v1095_v16 = vadd.f32 %v1094_v11, %v1093_v8 }
 0x3f3   :  { %v1074_v13 = vpop.f32.mrf.mxu0  ;;  %v1096_v14 = vpop.f32.mrf.mxu1 }
 0x3f4   :  { %v901_v15 = vadd.f32 %v1073_v12, %v1006_v9 }
 0x3f5   :  { %v1075_v17 = vpop.f32.mrf.mxu0  ;;  %v1097_v18 = vpop.f32.mrf.mxu1 }
 0x3f6   :  { %v941_v19 = vadd.f32 %v1095_v16, %v901_v15 }
 0x3f8   :  { %v946_v20 = vsub.f32 0.0, %v941_v19 }
 0x3fa   :  { %v947_v21 = vmul.f32 1.442695, %v946_v20 }
 0x3fc   :  { %1233 = vpow2.f32 %v947_v21 }
 0x409   :  { %v1234_v22 = vpop.eup %1233 }
 0x40a   :  { %v949_v23 = vadd.f32 1.0, %v1234_v22 }
 0x40c   :  { %1235 = vrcp.f32 %v949_v23 }
 0x419   :  { %v1236_v24 = vpop.eup %1235 }
 0x41a   :  { %951 = vst.msk [vmem:[%s1568_s11] sm:$0xff] %vm80_vm1, %v1236_v24 }

</bundles_post_ra>
